<compile_context>
chip_gen: v5e
topology: v5e:2x2
jax: 0.10.0
libtpu: 0.0.40
codegen_flags: <defaults>
</compile_context>

<pallas_src>
import numpy as np

import jax
import jax.numpy as jnp
from jax.experimental import pallas as pl
from jax.experimental.pallas import tpu as pltpu

_LANE = 384            # lcm(3, 128): 128 interleaved (x, y, tz) triples per row
_ALIGN = 8 * _LANE     # 3072 elements = one full (8, 384) f32 tile
assert _LANE % 3 == 0 and _LANE % 128 == 0, "roll trick requires lcm(3,128) lanes"


def _txty_kernel(params_ref, in_ref, out_ref):
    """params_ref: (4, 384) rows = [scale, offset, coef, channel-id].
    in_ref / out_ref: (tile_rows, 384) interleaved (x, y, tz) triples."""
    scale = params_ref[0:1, :]
    off   = params_ref[1:2, :]
    coef  = params_ref[2:3, :]
    ch    = params_ref[3:4, :]

    v = in_ref[...]
    # s = x' (= x/img_scale - px) on ch0 lanes, y' on ch1 lanes, tz on ch2 lanes.
    s = v * scale - off
    n = s.shape[-1]
    # Bring each triple's tz onto its x lane (j <- j+2) and y lane (j <- j+1).
    # Lane wraparound only lands on lanes masked out by the selects below.
    tz_at_x = pltpu.roll(s, n - 2, axis=1)
    tz_at_y = pltpu.roll(s, n - 1, axis=1)
    tz_sel = jnp.where(ch == 0.0, tz_at_x, tz_at_y)
    out_ref[...] = jnp.where(ch == 2.0, s, s * tz_sel * coef)


def _tile_policy():
    """Returns (cap_rows, vmem_limit_bytes, want_multi_step) per TPU generation."""
    try:
        kind = jax.devices()[0].device_kind.lower()
    except Exception:
        kind = ""
    if "v5" in kind:
        # 3 MiB blocks; 12 MiB with in+out double-buffered -> fits 16 MiB scoped default.
        return 2048, None, False
    if "v6" in kind:
        # 6 MiB blocks; raise scoped VMEM for headroom.
        return 4096, 64 * 1024 * 1024, False
    if "v7" in kind:
        # 64 MiB physical VMEM: keep 4x block <= ~24-32 MiB; feed both TensorCores.
        return 4096, 32 * 1024 * 1024, True
    return 2048, None, False


def calculate_tx_ty(inputs, fx=572.4114, fy=573.57043, px=325.2611,
                    py=242.04899, tz_scale=1000.0,
                    image_scale=1.6666666666666667, *, max_tile_rows=None):
    """inputs: (B, N, 3) float -> (B, N, 3) float, matching the torch module."""
    B, N, C = inputs.shape
    assert C == 3, "last dim must be 3 (x, y, tz)"
    dtype = inputs.dtype
    total = B * N * 3

    inv_scale = 1.0 / image_scale
    inv_fx = 1.0 / fx
    inv_fy = 1.0 / fy

    def tail_formula(flat_tail):
        xyz = flat_tail.reshape(-1, 3)
        x = xyz[:, 0] * inv_scale - px
        y = xyz[:, 1] * inv_scale - py
        tz = xyz[:, 2] * tz_scale
        return jnp.stack([x * tz * inv_fx, y * tz * inv_fy, tz], axis=-1).reshape(-1)

    flat = inputs.reshape(total)                   # contiguous -> free reshape
    aligned = (total // _ALIGN) * _ALIGN
    if aligned == 0:
        # Smaller than a single (8, 384) tile: plain jnp is the right tool.
        return tail_formula(flat).reshape(B, N, 3)

    rows = aligned // _LANE                        # multiple of 8

    cap, vmem_limit, want_multi_step = _tile_policy()
    if max_tile_rows is not None:
        cap = max_tile_rows
    cap = max(8, (cap // 8) * 8)
    tile_rows = min(cap, rows)
    if want_multi_step and rows >= 16:
        # v7x: aim for >= 4 grid steps so both TensorCores get work.
        tile_rows = min(tile_rows, max(8, (rows // 4) // 8 * 8))

    # Per-lane channel constants, baked once at trace time (no iota/mod in-kernel).
    ch = np.arange(_LANE) % 3
    params = np.stack([
        np.where(ch == 2, tz_scale, inv_scale),                     # scale
        np.where(ch == 0, px, np.where(ch == 1, py, 0.0)),          # offset
        np.where(ch == 0, inv_fx, np.where(ch == 1, inv_fy, 0.0)),  # coefficient
        ch.astype(np.float64),                                      # channel id
    ]).astype(dtype)
    params = jnp.asarray(params)                                    # (4, 384)

    slab = (flat if aligned == total else flat[:aligned]).reshape(rows, _LANE)

    out_slab = pl.pallas_call(
        _txty_kernel,
        out_shape=jax.ShapeDtypeStruct((rows, _LANE), dtype),
        grid=(pl.cdiv(rows, tile_rows),),          # partial last block is OOB-masked
        in_specs=[pl.BlockSpec((4, _LANE), lambda i: (0, 0)),
                  pl.BlockSpec((tile_rows, _LANE), lambda i: (i, 0))],
        out_specs=pl.BlockSpec((tile_rows, _LANE), lambda i: (i, 0)),
        compiler_params=pltpu.CompilerParams(
            dimension_semantics=("parallel",),
            vmem_limit_bytes=vmem_limit),
        cost_estimate=pl.CostEstimate(
            flops=5 * aligned,
            transcendentals=0,
            bytes_accessed=2 * aligned * inputs.dtype.itemsize),
    )(params, slab)

    main = out_slab.reshape(aligned)
    if aligned == total:
        return main.reshape(B, N, 3)               # common case: zero extra copies
    tail = tail_formula(flat[aligned:])
    return jnp.concatenate([main, tail]).reshape(B, N, 3)


def _reference(inputs, fx=572.4114, fy=573.57043, px=325.2611, py=242.04899,
               tz_scale=1000.0, image_scale=1.6666666666666667):
    x = inputs[:, :, 0] / image_scale - px
    y = inputs[:, :, 1] / image_scale - py
    tz = inputs[:, :, 2] * tz_scale
    return jnp.stack([x * tz / fx, y * tz / fy, tz], axis=-1)


if __name__ == "__main__":
    key = jax.random.PRNGKey(0)

    # Primary small shape: 2 batches x 512 points = exactly one aligned (8, 384) slab.
    B, N = 2, 512
    inputs = jax.random.uniform(key, (B, N, 3), dtype=jnp.float32) * 100.0
    out = jax.block_until_ready(calculate_tx_ty(inputs))
    ref = _reference(inputs)
    assert out.shape == (B, N, 3)
    assert jnp.allclose(out, ref, rtol=1e-5, atol=1e-3), "mismatch vs reference (aligned)"

    # Ragged size + multi-step grid: 6150 elems -> 16 aligned rows + 6-element jnp tail.
    inputs2 = jax.random.uniform(jax.random.PRNGKey(1), (2, 1025, 3),
                                 dtype=jnp.float32) * 100.0
    out2 = jax.block_until_ready(calculate_tx_ty(inputs2, max_tile_rows=8))
    ref2 = _reference(inputs2)
    assert jnp.allclose(out2, ref2, rtol=1e-5, atol=1e-3), "mismatch vs reference (ragged)"

    # Partial (OOB-masked) last block: 24 rows with 16-row tiles -> grid of 2.
    inputs3 = jax.random.uniform(jax.random.PRNGKey(2), (2, 1536, 3),
                                 dtype=jnp.float32) * 100.0
    out3 = jax.block_until_ready(calculate_tx_ty(inputs3, max_tile_rows=16))
    ref3 = _reference(inputs3)
    assert jnp.allclose(out3, ref3, rtol=1e-5, atol=1e-3), "mismatch vs reference (partial block)"

    # Tiny module-implied shape (batch=2, 8 points) -> pure-jnp fallback path.
    inputs4 = jax.random.uniform(jax.random.PRNGKey(3), (2, 8, 3),
                                 dtype=jnp.float32) * 100.0
    out4 = jax.block_until_ready(calculate_tx_ty(inputs4))
    ref4 = _reference(inputs4)
    assert jnp.allclose(out4, ref4, rtol=1e-5, atol=1e-3), "mismatch vs reference (tiny)"

    print("KERNEL_OK")
</pallas_src>

<mosaic_0001>
module attributes {stable_mosaic.version = 11 : i64} {
  func.func @_txty_kernel(%arg0: i32, %arg1: memref<4x384xf32, #tpu.memory_space<vmem>>, %arg2: memref<8x384xf32, #tpu.memory_space<vmem>>, %arg3: memref<8x384xf32, #tpu.memory_space<vmem>>) attributes {dimension_semantics = [#tpu.dimension_semantics<parallel>], iteration_bounds = array<i64: 1>, scalar_prefetch = 0 : i64, scratch_operands = 0 : i64, tpu.core_type = #tpu.core_type<tc>, window_params = [{pipeline_mode = #tpu.pipeline_mode<synchronous>, transform_indices = @transform_0, window_bounds = array<i64: 4, 384>}, {transform_indices = @transform_1, window_bounds = array<i64: 8, 384>}, {transform_indices = @transform_2, window_bounds = array<i64: 8, 384>}]} {
    %c0 = arith.constant 0 : index
    %c0_0 = arith.constant 0 : index
    %0 = vector.load %arg1[%c0, %c0_0] : memref<4x384xf32, #tpu.memory_space<vmem>>, vector<1x384xf32>
    %c1 = arith.constant 1 : index
    %c0_1 = arith.constant 0 : index
    %1 = vector.load %arg1[%c1, %c0_1] : memref<4x384xf32, #tpu.memory_space<vmem>>, vector<1x384xf32>
    %c2 = arith.constant 2 : index
    %c0_2 = arith.constant 0 : index
    %2 = vector.load %arg1[%c2, %c0_2] : memref<4x384xf32, #tpu.memory_space<vmem>>, vector<1x384xf32>
    %c3 = arith.constant 3 : index
    %c0_3 = arith.constant 0 : index
    %3 = vector.load %arg1[%c3, %c0_3] : memref<4x384xf32, #tpu.memory_space<vmem>>, vector<1x384xf32>
    %c0_4 = arith.constant 0 : index
    %c0_5 = arith.constant 0 : index
    %4 = vector.load %arg2[%c0_4, %c0_5] : memref<8x384xf32, #tpu.memory_space<vmem>>, vector<8x384xf32>
    %5 = vector.broadcast %0 : vector<1x384xf32> to vector<8x384xf32>
    %6 = arith.mulf %4, %5 : vector<8x384xf32>
    %7 = vector.broadcast %1 : vector<1x384xf32> to vector<8x384xf32>
    %8 = arith.subf %6, %7 : vector<8x384xf32>
    %c382_i32 = arith.constant 382 : i32
    %9 = tpu.dynamic_rotate %8 by %c382_i32 dim 1 : vector<8x384xf32>, i32 -> vector<8x384xf32>
    %c383_i32 = arith.constant 383 : i32
    %10 = tpu.dynamic_rotate %8 by %c383_i32 dim 1 : vector<8x384xf32>, i32 -> vector<8x384xf32>
    %cst = arith.constant 0.000000e+00 : f32
    %11 = vector.broadcast %cst : f32 to vector<1x384xf32>
    %12 = arith.cmpf oeq, %3, %11 : vector<1x384xf32>
    %13 = vector.shape_cast %12 : vector<1x384xi1> to vector<1x384xi1>
    %14 = vector.broadcast %13 : vector<1x384xi1> to vector<8x384xi1>
    %15 = arith.select %14, %9, %10 : vector<8x384xi1>, vector<8x384xf32>
    %cst_6 = arith.constant 2.000000e+00 : f32
    %16 = vector.broadcast %cst_6 : f32 to vector<1x384xf32>
    %17 = arith.cmpf oeq, %3, %16 : vector<1x384xf32>
    %18 = arith.mulf %8, %15 : vector<8x384xf32>
    %19 = vector.broadcast %2 : vector<1x384xf32> to vector<8x384xf32>
    %20 = arith.mulf %18, %19 : vector<8x384xf32>
    %21 = vector.shape_cast %17 : vector<1x384xi1> to vector<1x384xi1>
    %22 = vector.broadcast %21 : vector<1x384xi1> to vector<8x384xi1>
    %23 = arith.select %22, %8, %20 : vector<8x384xi1>, vector<8x384xf32>
    %c0_7 = arith.constant 0 : index
    %c0_8 = arith.constant 0 : index
    %24 = vector.load %arg3[%c0_7, %c0_8] : memref<8x384xf32, #tpu.memory_space<vmem>>, vector<8x384xf32>
    tpu.vector_store %arg3[%c0_7, %c0_8], %23 {strides = array<i32>} : memref<8x384xf32, #tpu.memory_space<vmem>>, vector<8x384xf32>,
    return
  }
  func.func @transform_0(%arg0: i32) -> (i32, i32) {
    %c0_i32 = arith.constant 0 : i32
    %c0_i32_0 = arith.constant 0 : i32
    %c0_i32_1 = arith.constant 0 : i32
    return %c0_i32, %c0_i32_0 : i32, i32
  }
  func.func @transform_1(%arg0: i32) -> (i32, i32) {
    %c0_i32 = arith.constant 0 : i32
    %c0_i32_0 = arith.constant 0 : i32
    return %arg0, %c0_i32 : i32, i32
  }
  func.func @transform_2(%arg0: i32) -> (i32, i32) {
    %c0_i32 = arith.constant 0 : i32
    %c0_i32_0 = arith.constant 0 : i32
    return %arg0, %c0_i32 : i32, i32
  }
}

</mosaic_0001>

<bundles_post_ra>
// kernel: tpu_custom_call.1
= control target key start
LH: loop header
LB: loop body
LE: loop exit
PB: predicated region body
PF: predicated region fallthrough
CT: control target
= control target key end

     0   :  { %7 = vsyncpa [#allocation3], 0  ;;  %s304_s0 = inlined_call_operand.hbm [shape: f32[4,384], index: 0, kind: input, shape index: {}]   ;;  %s305_s1 = inlined_call_operand.hbm [shape: f32[8,384], index: 1, kind: input, shape index: {}]   ;;  %s306_s2 = inlined_call_operand.hbm [shape: f32[8,384], index: 2, kind: output, shape index: {}]  }
   0x1   :  { %8 = vsyncpa [#allocation6], 0 }
   0x2   :  { %9 = vsyncpa [#allocation4], 0  ;;  %s15_s11 = sshll.u32 %s304_s0, 4  ;;  %s232_s12 = smov [#allocation2]   ;;  %s16_s11 = int_to_ptr.hbm [resolvable:$true] %s15_s11 }
   0x3   :  { %s17_s13 = sshll.u32 %s232_s12, 4  ;;  %s26_s16 = sshll.u32 %s305_s1, 4  ;;  %s18_s13 = int_to_ptr.vmem [resolvable:$true] %s17_s13  ;;  %s27_s16 = int_to_ptr.hbm [resolvable:$true] %s26_s16 }
   0x4   :  { %20 = dma.hbm_to_vmem [thread:$0]  %s16_s11, 192, %s18_s13, [#allocation3]  }
   0x5   :  { %s233_s17 = smov [#allocation5]  }
   0x6   :  { %s28_s18 = sshll.u32 %s233_s17, 4  ;;  %s29_s18 = int_to_ptr.vmem [resolvable:$true] %s28_s18 }
   0x7   :  { %31 = dma.hbm_to_vmem [thread:$0]  %s27_s16, 384, %s29_s18, [#allocation6]  }
   0x8   :  { %226 = dma.done.wait [#allocation3], 192  }
   0x9   :  { %227 = vsyncadd [#allocation3], 4294967104 }
   0xa   :  { %228 = dma.done.wait [#allocation6], 384  }
   0xb   :  { %229 = vsyncadd [#allocation6], 4294966912  ;;  %v40_v0 = vld [vmem:[#allocation2] ss:$4 sm:$0x7]  ;;  %v47_v5 = vld [vmem:[#allocation5] sm:$0xff]  ;;  %v76_v19 = vlaneseq }
   0xc   :  { %v42_v1 = vld [vmem:[#allocation2 + $0x1] ss:$4 sm:$0x7]  ;;  %v53_v3 = vperm.slane %v40_v0, 2  ;;  %v51_v6 = vperm.slane %v40_v0, 0  ;;  %v48_v8 = vld [vmem:[#allocation5 + $0x8] sm:$0xff] }
   0xd   :  { %v49_v2 = vld [vmem:[#allocation5 + $0x10] sm:$0xff]  ;;  %v63_v4 = vperm.slane %v42_v1, 2  ;;  %v61_v7 = vperm.slane %v42_v1, 0  ;;  %v52_v9 = vperm.slane %v40_v0, 1  ;;  %v62_v10 = vperm.slane %v42_v1, 1  ;;  %s234_s0 = smov 126  }
   0xe   :  { %v59_v11 = vmul.f32 %v53_v3, %v49_v2  ;;  %v57_v12 = vmul.f32 %v51_v6, %v47_v5  ;;  %s235_s1 = smov 127   ;;  %v46_v17 = vld [vmem:[#allocation2 + $0x3] ss:$4 sm:$0x7]  ;;  %v236_v20 = vmov 0   ;;  %v77_v24 = vand.u32 127, %v76_v19 }
   0xf   :  { %v58_v13 = vmul.f32 %v52_v9, %v48_v8  ;;  %vm92_vm0 = vcmp.eq.f32.partialorder %v46_v17, 0.0  ;;  %vm103_vm1 = vcmp.eq.f32.partialorder %v46_v17, 2.0  ;;  %v44_v27 = vld [vmem:[#allocation2 + $0x2] ss:$4 sm:$0x7]  ;;  %s237_s19 = smov [#allocation7]  }
  0x10   :  { %v259_v14 = vsub.f32 %v59_v11, %v63_v4  ;;  %v261_v15 = vsub.f32 %v57_v12, %v61_v7  ;;  %v93_v21 = vsel %vm92_vm0, 1, %v236_v20  ;;  %v117_v29 = vsel %vm103_vm1, 1, %v236_v20  ;;  %s135_s20 = sshll.u32 %s237_s19, 4  ;;  %s137_s23 = sshll.u32 %s306_s2, 4  ;;  %s136_s20 = int_to_ptr.vmem [resolvable:$true] %s135_s20  ;;  %s138_s23 = int_to_ptr.hbm [resolvable:$true] %s137_s23 }
  0x11   :  { %v263_v16 = vsub.f32 %v58_v13, %v62_v10  ;;  %v96_v25 = vperm.slane %v93_v21, 2  ;;  %v94_v26 = vperm.slane %v93_v21, 0  ;;  %v95_v28 = vperm.slane %v93_v21, 1 }
  0x12   :  { %74 = vrot.lane.b32.xlu1 %v259_v14, %s234_s0  ;;  %70 = vrot.lane.b32.xlu0 %v261_v15, %s234_s0  ;;  %vm88_vm2 = vcmp.lt.s32.totalorder %v77_v24, 127  ;;  %vm78_vm3 = vcmp.lt.s32.totalorder %v77_v24, 126  ;;  %v110_v32 = vperm.slane %v44_v27, 2  ;;  %v108_v35 = vperm.slane %v44_v27, 0 }
  0x13   :  { %84 = vrot.lane.b32.xlu2 %v263_v16, %s235_s1  ;;  %vm271_vm4 = vcmp.eq.s32.totalorder %v96_v25, 1  ;;  %vm275_vm5 = vcmp.eq.s32.totalorder %v94_v26, 1  ;;  %vm279_vm6 = vcmp.eq.s32.totalorder %v95_v28, 1  ;;  %v109_v36 = vperm.slane %v44_v27, 1 }
  0x14   :  { %v118_v37 = vperm.slane %v117_v29, 0  ;;  %v119_v42 = vperm.slane %v117_v29, 1  ;;  %v120_v43 = vperm.slane %v117_v29, 2 }
  0x16   :  { %vm121_vm7 = vcmp.eq.s32.totalorder %v118_v37, 1  ;;  %vm122_vm8 = vcmp.eq.s32.totalorder %v119_v42, 1  ;;  %vm123_vm9 = vcmp.eq.s32.totalorder %v120_v43, 1 }
  0x1a   :  { %82 = vrot.lane.b32.xlu1 %v261_v15, %s235_s1  ;;  %72 = vrot.lane.b32.xlu0 %v263_v16, %s234_s0 }
  0x1b   :  { %86 = vrot.lane.b32.xlu2 %v259_v14, %s235_s1 }
  0x6d   :  { %v85_v18 = vpop.permute.xlu2 %84 }
  0x75   :  { %v87_v30 = vpop.permute.xlu2 %86 }
  0x76   :  { %v89_v38 = vsel %vm88_vm2, %v85_v18, %v87_v30 }
  0x84   :  { %v75_v22 = vpop.permute.xlu1 %74  ;;  %v71_v23 = vpop.permute.xlu0 %70 }
  0x85   :  { %v81_v39 = vsel %vm78_vm3, %v75_v22, %v71_v23 }
  0x8c   :  { %v83_v40 = vpop.permute.xlu1 %82  ;;  %v73_v41 = vpop.permute.xlu0 %72 }
  0x8d   :  { %v90_v44 = vsel %vm88_vm2, %v83_v40, %v85_v18  ;;  %v91_v45 = vsel %vm88_vm2, %v87_v30, %v83_v40  ;;  %v79_v46 = vsel %vm78_vm3, %v73_v41, %v75_v22  ;;  %v80_v47 = vsel %vm78_vm3, %v71_v23, %v73_v41 }
  0x8e   :  { %v102_v48 = vsel %vm271_vm4, %v81_v39, %v91_v45  ;;  %v100_v49 = vsel %vm275_vm5, %v80_v47, %v90_v44  ;;  %v101_v50 = vsel %vm279_vm6, %v79_v46, %v89_v38 }
  0x8f   :  { %v106_v51 = vmul.f32 %v102_v48, %v259_v14  ;;  %v104_v52 = vmul.f32 %v100_v49, %v261_v15  ;;  %v105_v53 = vmul.f32 %v101_v50, %v263_v16 }
  0x91   :  { %v116_v54 = vmul.f32 %v110_v32, %v106_v51  ;;  %v114_v55 = vmul.f32 %v108_v35, %v104_v52  ;;  %v115_v56 = vmul.f32 %v109_v36, %v105_v53 }
  0x93   :  { %v124_v57 = vsel %vm121_vm7, %v261_v15, %v114_v55  ;;  %v125_v58 = vsel %vm122_vm8, %v263_v16, %v115_v56  ;;  %v126_v59 = vsel %vm123_vm9, %v259_v14, %v116_v54 }
  0x94   :  { %127 = vst [vmem:[#allocation7] sm:$0xff] %v124_v57 }
  0x95   :  { %128 = vst [vmem:[#allocation7 + $0x8] sm:$0xff] %v125_v58 }
  0x96   :  { %129 = vst [vmem:[#allocation7 + $0x10] sm:$0xff] %v126_v59 }
  0x97   :  { %140 = dma.vmem_to_hbm [thread:$0]  %s136_s20, 384, %s138_s23, [#allocation4]  }
  0x98   :  { %230 = dma.done.wait [#allocation4], 384  }
  0x99   :  { %231 = vsyncadd [#allocation4], 4294966912 }
  0x9a   :  { %145 = vsyncpa [#allocation3], 1 }
  0x9b   :  { %146 = vsyncpa [#allocation6], 1 }
  0x9c   :  { %147 = vsyncpa [#allocation4], 1 }

</bundles_post_ra>
